<compile_context>
chip_gen: v6e
topology: v6e:2x2x1
jax: 0.10.0
libtpu: 0.0.40
codegen_flags: <defaults>
</compile_context>

<pallas_src>
import jax
import jax.numpy as jnp
from jax import lax
from jax.experimental import pallas as pl
from jax.experimental.pallas import tpu as pltpu

LANE = 128
SUBLANE = 8
TARGET_BLOCK_ROWS = 1024  # (1024,128) f32 = 512 KiB per stream per pipeline buffer


def _make_db_kernel(num_channels, block_rows, n_j, tail_rows):
    """Kernel over one (block_rows, 128) slice of one batch item per grid step."""
    has_binary = num_channels > 2

    def kernel(pred_ref, sgt_ref, smk_ref, tgt_ref, tmk_ref, neg_ref, acc_ref):
        b = pl.program_id(0)
        j = pl.program_id(1)

        @pl.when(jnp.logical_and(b == 0, j == 0))
        def _init():
            acc_ref[...] = jnp.zeros_like(acc_ref)

        sp = pred_ref[0].astype(jnp.float32)   # shrink prediction (prob in (0,1))
        tp = pred_ref[1].astype(jnp.float32)   # threshold prediction
        if has_binary:
            bp = pred_ref[2].astype(jnp.float32)  # binary prediction
        sgt = sgt_ref[...].astype(jnp.float32)    # shrink gt (0/1)
        smk = smk_ref[...].astype(jnp.float32)    # shrink mask (0/1)
        tgt = tgt_ref[...].astype(jnp.float32)    # threshold gt
        tmk = tmk_ref[...].astype(jnp.float32)    # threshold mask (0/1)

        if tail_rows:
            # Last j-block hangs past the array; Pallas reads unspecified padding
            # there, so sanitize before any math (NaN * 0 == NaN).
            row = lax.broadcasted_iota(jnp.int32, (block_rows, LANE), 0)
            valid = jnp.logical_or(j != n_j - 1, row < tail_rows)
            sp = jnp.where(valid, sp, 0.5)
            tp = jnp.where(valid, tp, 0.0)
            sgt = jnp.where(valid, sgt, 0.0)
            smk = jnp.where(valid, smk, 0.0)
            tgt = jnp.where(valid, tgt, 0.0)
            tmk = jnp.where(valid, tmk, 0.0)
            if has_binary:
                bp = jnp.where(valid, bp, 0.0)

        pos = sgt * smk          # (gt * mask)
        neg = smk - pos          # ((1 - gt) * mask) for binary gt/mask

        # torch F.binary_cross_entropy: -(gt*log(p) + (1-gt)*log(1-p)), log clamped at -100
        log_p = jnp.maximum(jnp.log(sp), -100.0)
        log_1mp = jnp.maximum(jnp.log(1.0 - sp), -100.0)
        bce = -(sgt * log_p + (1.0 - sgt) * log_1mp)

        pos_loss = bce * pos
        neg_loss = bce * neg
        neg_ref[...] = neg_loss.astype(neg_ref.dtype)  # needed by OHEM top-k in glue

        l1 = jnp.abs(tp - tgt) * tmk

        def tile_sum(x):  # (block_rows, 128) -> (8, 128); pure VPU vreg adds
            return jnp.sum(x.reshape(block_rows // SUBLANE, SUBLANE, LANE), axis=0)

        # stats layout:
        # 0: sum(bce*pos)  1: sum(pos)  2: sum(shrink_mask)  3: sum(|tp-tgt|*tmask)
        # 4: sum(tmask)   [5: sum(bp*pos)  6: sum(bp*smask)]  (dice, only if C > 2)
        parts = [pos_loss, pos, smk, l1, tmk]
        if has_binary:
            parts += [bp * pos, bp * smk]
        for k, p in enumerate(parts):
            acc_ref[k] += tile_sum(p)

    return kernel


def _single_pred_losses(pred, batch, ohem_ratio, eps):
    """Losses for a single head. pred: (B, C, H, W) NCHW. batch: dict of (B, H, W) maps."""
    B, C, H, W = pred.shape
    hw = H * W
    has_binary = C > 2
    n_stats = 7 if has_binary else 5

    # Lane-align H*W (reshape is copy-free; pad only when needed).
    rows_hw = max(-(-hw // LANE), SUBLANE)
    hw_pad = rows_hw * LANE

    pred3 = pred.reshape(B, C, hw)
    maps = [batch['shrink_map'].reshape(B, hw),
            batch['shrink_mask'].reshape(B, hw),
            batch['threshold_map'].reshape(B, hw),
            batch['threshold_mask'].reshape(B, hw)]
    if hw_pad != hw:
        pad = hw_pad - hw
        # 0.5 keeps log() benign on the shrink channel; masks pad with 0 so padded
        # pixels contribute nothing to any statistic.
        pred3 = jnp.pad(pred3, ((0, 0), (0, 0), (0, pad)), constant_values=0.5)
        maps = [jnp.pad(m, ((0, 0), (0, pad))) for m in maps]

    pred4 = pred3.reshape(B, C, rows_hw, LANE)
    maps3 = [m.reshape(B, rows_hw, LANE) for m in maps]

    block_rows = min(TARGET_BLOCK_ROWS, (rows_hw // SUBLANE) * SUBLANE)
    n_j = -(-rows_hw // block_rows)
    tail_rows = rows_hw % block_rows  # 0 => no ragged last block

    kernel = _make_db_kernel(C, block_rows, n_j, tail_rows)

    pred_spec = pl.BlockSpec((None, C, block_rows, LANE), lambda b, j: (b, 0, j, 0))
    map_spec = pl.BlockSpec((None, block_rows, LANE), lambda b, j: (b, j, 0))
    acc_spec = pl.BlockSpec((n_stats, SUBLANE, LANE), lambda b, j: (0, 0, 0))

    neg_loss, acc = pl.pallas_call(
        kernel,
        out_shape=(jax.ShapeDtypeStruct((B, rows_hw, LANE), jnp.float32),
                   jax.ShapeDtypeStruct((n_stats, SUBLANE, LANE), jnp.float32)),
        grid=(B, n_j),
        in_specs=[pred_spec] + [map_spec] * 4,
        out_specs=(map_spec, acc_spec),
        compiler_params=pltpu.CompilerParams(
            dimension_semantics=("arbitrary", "arbitrary")),
    )(pred4, *maps3)

    stats = jnp.sum(acc, axis=(1, 2))
    pos_loss_sum = stats[0]
    pos_cnt = stats[1]
    smk_sum = stats[2]
    l1_sum = stats[3]
    tmk_sum = stats[4]
    neg_cnt = smk_sum - pos_cnt

    # --- BalanceCrossEntropyLoss (OHEM hard-negative mining) ---
    # negative_count = min(int(neg.sum()), int(pos_count * ratio))
    neg_k = jnp.minimum(neg_cnt, jnp.floor(pos_cnt * ohem_ratio))
    # TODO(synk): dynamic-k OHEM top-k has no clean Pallas/TPU equivalent; full sort in
    # plain JAX on the kernel-produced negative-loss map. Padded entries are exactly 0
    # and can never displace a real negative (neg_k <= neg_cnt). A histogram/threshold
    # two-pass would be cheaper at production resolutions.
    neg_sorted = jnp.sort(neg_loss.reshape(-1))[::-1]
    take = jnp.arange(neg_sorted.shape[0], dtype=jnp.float32) < neg_k
    neg_sum = jnp.sum(jnp.where(take, neg_sorted, 0.0))
    loss_shrink = (pos_loss_sum + neg_sum) / (pos_cnt + neg_k + eps)

    # --- MaskL1Loss ---
    loss_thresh = l1_sum / (tmk_sum + eps)

    # --- DiceLoss (sum(gt*mask) == pos_cnt, reused) ---
    if has_binary:
        inter = stats[5]
        bsum = stats[6]
        loss_binary = 1.0 - 2.0 * inter / (bsum + pos_cnt + eps)
    else:
        loss_binary = jnp.float32(0.0)

    return loss_shrink, loss_thresh, loss_binary


def db_loss_v2(preds, targets, alpha=1.0, beta=10.0, ohem_ratio=3.0,
               reduction='mean', eps=1e-6):
    assert reduction in ['mean', 'sum']
    metrics = {'loss_shrink_maps': jnp.float32(0.0),
               'loss_threshold_maps': jnp.float32(0.0),
               'loss_binary_maps': jnp.float32(0.0),
               'loss': jnp.float32(0.0)}
    for pred, batch, label in zip(preds, targets, ['even', 'odd']):
        ls, lt, lb = _single_pred_losses(pred, batch, ohem_ratio, eps)
        metrics['loss_shrink_maps'] += ls
        metrics['loss_threshold_maps'] += lt
        if pred.shape[1] > 2:
            metrics['loss_binary_maps'] += lb
            loss_all = alpha * ls + beta * lt + lb
            metrics['loss'] += loss_all
            metrics[f'{label}_loss'] = loss_all
        else:
            metrics['loss'] += ls
            metrics[f'{label}_loss'] = ls
    return metrics


if __name__ == "__main__":
    key = jax.random.PRNGKey(0)
    B, C, H, W = 2, 3, 32, 32

    preds = []
    targets = []
    for _ in range(2):  # 'even' and 'odd' heads
        key, k1, k2, k3, k4, k5 = jax.random.split(key, 6)
        pred = jax.nn.sigmoid(jax.random.normal(k1, (B, C, H, W), dtype=jnp.float32))
        batch = {
            'shrink_map': (jax.random.uniform(k2, (B, H, W)) > 0.7).astype(jnp.float32),
            'shrink_mask': (jax.random.uniform(k3, (B, H, W)) > 0.1).astype(jnp.float32),
            'threshold_map': jax.random.uniform(k4, (B, H, W), dtype=jnp.float32),
            'threshold_mask': (jax.random.uniform(k5, (B, H, W)) > 0.5).astype(jnp.float32),
        }
        preds.append(pred)
        targets.append(batch)

    metrics = db_loss_v2(preds, targets, alpha=1.0, beta=10.0, ohem_ratio=3.0,
                         reduction='mean', eps=1e-6)
    jax.block_until_ready(metrics['loss'])
    print("KERNEL_OK")
</pallas_src>

<mosaic_0001>
module attributes {stable_mosaic.version = 11 : i64} {
  func.func @kernel(%arg0: i32, %arg1: i32, %arg2: memref<1x3x8x128xf32, #tpu.memory_space<vmem>>, %arg3: memref<1x8x128xf32, #tpu.memory_space<vmem>>, %arg4: memref<1x8x128xf32, #tpu.memory_space<vmem>>, %arg5: memref<1x8x128xf32, #tpu.memory_space<vmem>>, %arg6: memref<1x8x128xf32, #tpu.memory_space<vmem>>, %arg7: memref<1x8x128xf32, #tpu.memory_space<vmem>>, %arg8: memref<7x8x128xf32, #tpu.memory_space<vmem>>) attributes {dimension_semantics = [#tpu.dimension_semantics<arbitrary>, #tpu.dimension_semantics<arbitrary>], iteration_bounds = array<i64: 2, 1>, scalar_prefetch = 0 : i64, scratch_operands = 0 : i64, tpu.core_type = #tpu.core_type<tc>, window_params = [{transform_indices = @transform_0, window_bounds = array<i64: 1, 3, 8, 128>}, {transform_indices = @transform_1, window_bounds = array<i64: 1, 8, 128>}, {transform_indices = @transform_2, window_bounds = array<i64: 1, 8, 128>}, {transform_indices = @transform_3, window_bounds = array<i64: 1, 8, 128>}, {transform_indices = @transform_4, window_bounds = array<i64: 1, 8, 128>}, {transform_indices = @transform_5, window_bounds = array<i64: 1, 8, 128>}, {pipeline_mode = #tpu.pipeline_mode<synchronous>, transform_indices = @transform_6, window_bounds = array<i64: 7, 8, 128>}]} {
    %c0_i32 = arith.constant 0 : i32
    %0 = arith.cmpi eq, %arg0, %c0_i32 : i32
    %c0_i32_0 = arith.constant 0 : i32
    %1 = arith.cmpi eq, %arg1, %c0_i32_0 : i32
    %2 = arith.andi %0, %1 : i1
    %3 = arith.extui %2 : i1 to i32
    %c0_i32_1 = arith.constant 0 : i32
    %4 = arith.cmpi ne, %3, %c0_i32_1 : i32
    scf.if %4 {
      %cst_75 = arith.constant 0.000000e+00 : f32
      %102 = vector.broadcast %cst_75 : f32 to vector<7x8x128xf32>
      %c0_76 = arith.constant 0 : index
      %c0_77 = arith.constant 0 : index
      %c0_78 = arith.constant 0 : index
      %103 = vector.load %arg8[%c0_76, %c0_77, %c0_78] : memref<7x8x128xf32, #tpu.memory_space<vmem>>, vector<7x8x128xf32>
      tpu.vector_store %arg8[%c0_76, %c0_77, %c0_78], %102 {strides = array<i32>} : memref<7x8x128xf32, #tpu.memory_space<vmem>>, vector<7x8x128xf32>,
    } else {
    }
    %c0 = arith.constant 0 : index
    %c0_2 = arith.constant 0 : index
    %c0_3 = arith.constant 0 : index
    %c0_4 = arith.constant 0 : index
    %5 = vector.load %arg2[%c0, %c0_2, %c0_3, %c0_4] : memref<1x3x8x128xf32, #tpu.memory_space<vmem>>, vector<1x1x8x128xf32>
    %6 = vector.shape_cast %5 : vector<1x1x8x128xf32> to vector<8x128xf32>
    %c0_5 = arith.constant 0 : index
    %c1 = arith.constant 1 : index
    %c0_6 = arith.constant 0 : index
    %c0_7 = arith.constant 0 : index
    %7 = vector.load %arg2[%c0_5, %c1, %c0_6, %c0_7] : memref<1x3x8x128xf32, #tpu.memory_space<vmem>>, vector<1x1x8x128xf32>
    %8 = vector.shape_cast %7 : vector<1x1x8x128xf32> to vector<8x128xf32>
    %c0_8 = arith.constant 0 : index
    %c2 = arith.constant 2 : index
    %c0_9 = arith.constant 0 : index
    %c0_10 = arith.constant 0 : index
    %9 = vector.load %arg2[%c0_8, %c2, %c0_9, %c0_10] : memref<1x3x8x128xf32, #tpu.memory_space<vmem>>, vector<1x1x8x128xf32>
    %10 = vector.shape_cast %9 : vector<1x1x8x128xf32> to vector<8x128xf32>
    %c0_11 = arith.constant 0 : index
    %c0_12 = arith.constant 0 : index
    %c0_13 = arith.constant 0 : index
    %11 = vector.load %arg3[%c0_11, %c0_12, %c0_13] : memref<1x8x128xf32, #tpu.memory_space<vmem>>, vector<1x8x128xf32>
    %12 = vector.shape_cast %11 : vector<1x8x128xf32> to vector<8x128xf32>
    %c0_14 = arith.constant 0 : index
    %c0_15 = arith.constant 0 : index
    %c0_16 = arith.constant 0 : index
    %13 = vector.load %arg4[%c0_14, %c0_15, %c0_16] : memref<1x8x128xf32, #tpu.memory_space<vmem>>, vector<1x8x128xf32>
    %14 = vector.shape_cast %13 : vector<1x8x128xf32> to vector<8x128xf32>
    %c0_17 = arith.constant 0 : index
    %c0_18 = arith.constant 0 : index
    %c0_19 = arith.constant 0 : index
    %15 = vector.load %arg5[%c0_17, %c0_18, %c0_19] : memref<1x8x128xf32, #tpu.memory_space<vmem>>, vector<1x8x128xf32>
    %16 = vector.shape_cast %15 : vector<1x8x128xf32> to vector<8x128xf32>
    %c0_20 = arith.constant 0 : index
    %c0_21 = arith.constant 0 : index
    %c0_22 = arith.constant 0 : index
    %17 = vector.load %arg6[%c0_20, %c0_21, %c0_22] : memref<1x8x128xf32, #tpu.memory_space<vmem>>, vector<1x8x128xf32>
    %18 = vector.shape_cast %17 : vector<1x8x128xf32> to vector<8x128xf32>
    %19 = arith.mulf %12, %14 : vector<8x128xf32>
    %20 = arith.subf %14, %19 : vector<8x128xf32>
    %21 = math.log %6 : vector<8x128xf32>
    %cst = arith.constant -1.000000e+02 : f32
    %22 = vector.broadcast %cst : f32 to vector<8x128xf32>
    %23 = arith.maximumf %21, %22 : vector<8x128xf32>
    %cst_23 = arith.constant 1.000000e+00 : f32
    %24 = vector.broadcast %cst_23 : f32 to vector<8x128xf32>
    %25 = arith.subf %24, %6 : vector<8x128xf32>
    %26 = math.log %25 : vector<8x128xf32>
    %cst_24 = arith.constant -1.000000e+02 : f32
    %27 = vector.broadcast %cst_24 : f32 to vector<8x128xf32>
    %28 = arith.maximumf %26, %27 : vector<8x128xf32>
    %29 = arith.mulf %12, %23 : vector<8x128xf32>
    %cst_25 = arith.constant 1.000000e+00 : f32
    %30 = vector.broadcast %cst_25 : f32 to vector<8x128xf32>
    %31 = arith.subf %30, %12 : vector<8x128xf32>
    %32 = arith.mulf %31, %28 : vector<8x128xf32>
    %33 = arith.addf %29, %32 : vector<8x128xf32>
    %cst_26 = arith.constant 0.000000e+00 : f32
    %34 = vector.broadcast %cst_26 : f32 to vector<8x128xf32>
    %35 = arith.subf %34, %33 : vector<8x128xf32>
    %36 = arith.mulf %35, %19 : vector<8x128xf32>
    %37 = arith.mulf %35, %20 : vector<8x128xf32>
    %c0_27 = arith.constant 0 : index
    %c0_28 = arith.constant 0 : index
    %c0_29 = arith.constant 0 : index
    %38 = vector.load %arg7[%c0_27, %c0_28, %c0_29] : memref<1x8x128xf32, #tpu.memory_space<vmem>>, vector<1x8x128xf32>
    %39 = vector.shape_cast %38 : vector<1x8x128xf32> to vector<8x128xf32>
    %40 = vector.shape_cast %37 : vector<8x128xf32> to vector<1x8x128xf32>
    tpu.vector_store %arg7[%c0_27, %c0_28, %c0_29], %40 {strides = array<i32>} : memref<1x8x128xf32, #tpu.memory_space<vmem>>, vector<1x8x128xf32>,
    %41 = arith.subf %8, %16 : vector<8x128xf32>
    %42 = math.absf %41 : vector<8x128xf32>
    %43 = arith.mulf %42, %18 : vector<8x128xf32>
    %44 = arith.mulf %10, %19 : vector<8x128xf32>
    %45 = arith.mulf %10, %14 : vector<8x128xf32>
    %c0_30 = arith.constant 0 : index
    %c0_31 = arith.constant 0 : index
    %c0_32 = arith.constant 0 : index
    %46 = vector.load %arg8[%c0_30, %c0_31, %c0_32] : memref<7x8x128xf32, #tpu.memory_space<vmem>>, vector<1x8x128xf32>
    %47 = vector.shape_cast %46 : vector<1x8x128xf32> to vector<8x128xf32>
    %48 = vector.shape_cast %36 : vector<8x128xf32> to vector<1x8x128xf32>
    %cst_33 = arith.constant dense<0.000000e+00> : vector<8x128xf32>
    %49 = vector.multi_reduction <add>, %48, %cst_33 [0] : vector<1x8x128xf32> to vector<8x128xf32>
    %50 = arith.addf %47, %49 : vector<8x128xf32>
    %c0_34 = arith.constant 0 : index
    %c0_35 = arith.constant 0 : index
    %c0_36 = arith.constant 0 : index
    %51 = vector.load %arg8[%c0_34, %c0_35, %c0_36] : memref<7x8x128xf32, #tpu.memory_space<vmem>>, vector<1x8x128xf32>
    %52 = vector.shape_cast %51 : vector<1x8x128xf32> to vector<8x128xf32>
    %53 = vector.shape_cast %50 : vector<8x128xf32> to vector<1x8x128xf32>
    tpu.vector_store %arg8[%c0_34, %c0_35, %c0_36], %53 {strides = array<i32>} : memref<7x8x128xf32, #tpu.memory_space<vmem>>, vector<1x8x128xf32>,
    %c1_37 = arith.constant 1 : index
    %c0_38 = arith.constant 0 : index
    %c0_39 = arith.constant 0 : index
    %54 = vector.load %arg8[%c1_37, %c0_38, %c0_39] : memref<7x8x128xf32, #tpu.memory_space<vmem>>, vector<1x8x128xf32>
    %55 = vector.shape_cast %54 : vector<1x8x128xf32> to vector<8x128xf32>
    %56 = vector.shape_cast %19 : vector<8x128xf32> to vector<1x8x128xf32>
    %cst_40 = arith.constant dense<0.000000e+00> : vector<8x128xf32>
    %57 = vector.multi_reduction <add>, %56, %cst_40 [0] : vector<1x8x128xf32> to vector<8x128xf32>
    %58 = arith.addf %55, %57 : vector<8x128xf32>
    %c1_41 = arith.constant 1 : index
    %c0_42 = arith.constant 0 : index
    %c0_43 = arith.constant 0 : index
    %59 = vector.load %arg8[%c1_41, %c0_42, %c0_43] : memref<7x8x128xf32, #tpu.memory_space<vmem>>, vector<1x8x128xf32>
    %60 = vector.shape_cast %59 : vector<1x8x128xf32> to vector<8x128xf32>
    %61 = vector.shape_cast %58 : vector<8x128xf32> to vector<1x8x128xf32>
    tpu.vector_store %arg8[%c1_41, %c0_42, %c0_43], %61 {strides = array<i32>} : memref<7x8x128xf32, #tpu.memory_space<vmem>>, vector<1x8x128xf32>,
    %c2_44 = arith.constant 2 : index
    %c0_45 = arith.constant 0 : index
    %c0_46 = arith.constant 0 : index
    %62 = vector.load %arg8[%c2_44, %c0_45, %c0_46] : memref<7x8x128xf32, #tpu.memory_space<vmem>>, vector<1x8x128xf32>
    %63 = vector.shape_cast %62 : vector<1x8x128xf32> to vector<8x128xf32>
    %64 = vector.shape_cast %14 : vector<8x128xf32> to vector<1x8x128xf32>
    %cst_47 = arith.constant dense<0.000000e+00> : vector<8x128xf32>
    %65 = vector.multi_reduction <add>, %64, %cst_47 [0] : vector<1x8x128xf32> to vector<8x128xf32>
    %66 = arith.addf %63, %65 : vector<8x128xf32>
    %c2_48 = arith.constant 2 : index
    %c0_49 = arith.constant 0 : index
    %c0_50 = arith.constant 0 : index
    %67 = vector.load %arg8[%c2_48, %c0_49, %c0_50] : memref<7x8x128xf32, #tpu.memory_space<vmem>>, vector<1x8x128xf32>
    %68 = vector.shape_cast %67 : vector<1x8x128xf32> to vector<8x128xf32>
    %69 = vector.shape_cast %66 : vector<8x128xf32> to vector<1x8x128xf32>
    tpu.vector_store %arg8[%c2_48, %c0_49, %c0_50], %69 {strides = array<i32>} : memref<7x8x128xf32, #tpu.memory_space<vmem>>, vector<1x8x128xf32>,
    %c3 = arith.constant 3 : index
    %c0_51 = arith.constant 0 : index
    %c0_52 = arith.constant 0 : index
    %70 = vector.load %arg8[%c3, %c0_51, %c0_52] : memref<7x8x128xf32, #tpu.memory_space<vmem>>, vector<1x8x128xf32>
    %71 = vector.shape_cast %70 : vector<1x8x128xf32> to vector<8x128xf32>
    %72 = vector.shape_cast %43 : vector<8x128xf32> to vector<1x8x128xf32>
    %cst_53 = arith.constant dense<0.000000e+00> : vector<8x128xf32>
    %73 = vector.multi_reduction <add>, %72, %cst_53 [0] : vector<1x8x128xf32> to vector<8x128xf32>
    %74 = arith.addf %71, %73 : vector<8x128xf32>
    %c3_54 = arith.constant 3 : index
    %c0_55 = arith.constant 0 : index
    %c0_56 = arith.constant 0 : index
    %75 = vector.load %arg8[%c3_54, %c0_55, %c0_56] : memref<7x8x128xf32, #tpu.memory_space<vmem>>, vector<1x8x128xf32>
    %76 = vector.shape_cast %75 : vector<1x8x128xf32> to vector<8x128xf32>
    %77 = vector.shape_cast %74 : vector<8x128xf32> to vector<1x8x128xf32>
    tpu.vector_store %arg8[%c3_54, %c0_55, %c0_56], %77 {strides = array<i32>} : memref<7x8x128xf32, #tpu.memory_space<vmem>>, vector<1x8x128xf32>,
    %c4 = arith.constant 4 : index
    %c0_57 = arith.constant 0 : index
    %c0_58 = arith.constant 0 : index
    %78 = vector.load %arg8[%c4, %c0_57, %c0_58] : memref<7x8x128xf32, #tpu.memory_space<vmem>>, vector<1x8x128xf32>
    %79 = vector.shape_cast %78 : vector<1x8x128xf32> to vector<8x128xf32>
    %80 = vector.shape_cast %18 : vector<8x128xf32> to vector<1x8x128xf32>
    %cst_59 = arith.constant dense<0.000000e+00> : vector<8x128xf32>
    %81 = vector.multi_reduction <add>, %80, %cst_59 [0] : vector<1x8x128xf32> to vector<8x128xf32>
    %82 = arith.addf %79, %81 : vector<8x128xf32>
    %c4_60 = arith.constant 4 : index
    %c0_61 = arith.constant 0 : index
    %c0_62 = arith.constant 0 : index
    %83 = vector.load %arg8[%c4_60, %c0_61, %c0_62] : memref<7x8x128xf32, #tpu.memory_space<vmem>>, vector<1x8x128xf32>
    %84 = vector.shape_cast %83 : vector<1x8x128xf32> to vector<8x128xf32>
    %85 = vector.shape_cast %82 : vector<8x128xf32> to vector<1x8x128xf32>
    tpu.vector_store %arg8[%c4_60, %c0_61, %c0_62], %85 {strides = array<i32>} : memref<7x8x128xf32, #tpu.memory_space<vmem>>, vector<1x8x128xf32>,
    %c5 = arith.constant 5 : index
    %c0_63 = arith.constant 0 : index
    %c0_64 = arith.constant 0 : index
    %86 = vector.load %arg8[%c5, %c0_63, %c0_64] : memref<7x8x128xf32, #tpu.memory_space<vmem>>, vector<1x8x128xf32>
    %87 = vector.shape_cast %86 : vector<1x8x128xf32> to vector<8x128xf32>
    %88 = vector.shape_cast %44 : vector<8x128xf32> to vector<1x8x128xf32>
    %cst_65 = arith.constant dense<0.000000e+00> : vector<8x128xf32>
    %89 = vector.multi_reduction <add>, %88, %cst_65 [0] : vector<1x8x128xf32> to vector<8x128xf32>
    %90 = arith.addf %87, %89 : vector<8x128xf32>
    %c5_66 = arith.constant 5 : index
    %c0_67 = arith.constant 0 : index
    %c0_68 = arith.constant 0 : index
    %91 = vector.load %arg8[%c5_66, %c0_67, %c0_68] : memref<7x8x128xf32, #tpu.memory_space<vmem>>, vector<1x8x128xf32>
    %92 = vector.shape_cast %91 : vector<1x8x128xf32> to vector<8x128xf32>
    %93 = vector.shape_cast %90 : vector<8x128xf32> to vector<1x8x128xf32>
    tpu.vector_store %arg8[%c5_66, %c0_67, %c0_68], %93 {strides = array<i32>} : memref<7x8x128xf32, #tpu.memory_space<vmem>>, vector<1x8x128xf32>,
    %c6 = arith.constant 6 : index
    %c0_69 = arith.constant 0 : index
    %c0_70 = arith.constant 0 : index
    %94 = vector.load %arg8[%c6, %c0_69, %c0_70] : memref<7x8x128xf32, #tpu.memory_space<vmem>>, vector<1x8x128xf32>
    %95 = vector.shape_cast %94 : vector<1x8x128xf32> to vector<8x128xf32>
    %96 = vector.shape_cast %45 : vector<8x128xf32> to vector<1x8x128xf32>
    %cst_71 = arith.constant dense<0.000000e+00> : vector<8x128xf32>
    %97 = vector.multi_reduction <add>, %96, %cst_71 [0] : vector<1x8x128xf32> to vector<8x128xf32>
    %98 = arith.addf %95, %97 : vector<8x128xf32>
    %c6_72 = arith.constant 6 : index
    %c0_73 = arith.constant 0 : index
    %c0_74 = arith.constant 0 : index
    %99 = vector.load %arg8[%c6_72, %c0_73, %c0_74] : memref<7x8x128xf32, #tpu.memory_space<vmem>>, vector<1x8x128xf32>
    %100 = vector.shape_cast %99 : vector<1x8x128xf32> to vector<8x128xf32>
    %101 = vector.shape_cast %98 : vector<8x128xf32> to vector<1x8x128xf32>
    tpu.vector_store %arg8[%c6_72, %c0_73, %c0_74], %101 {strides = array<i32>} : memref<7x8x128xf32, #tpu.memory_space<vmem>>, vector<1x8x128xf32>,
    return
  }
  func.func @transform_0(%arg0: i32, %arg1: i32) -> (i32, i32, i32, i32) {
    %c0_i32 = arith.constant 0 : i32
    %c0_i32_0 = arith.constant 0 : i32
    %c0_i32_1 = arith.constant 0 : i32
    return %arg0, %c0_i32, %arg1, %c0_i32_0 : i32, i32, i32, i32
  }
  func.func @transform_1(%arg0: i32, %arg1: i32) -> (i32, i32, i32) {
    %c0_i32 = arith.constant 0 : i32
    %c0_i32_0 = arith.constant 0 : i32
    return %arg0, %arg1, %c0_i32 : i32, i32, i32
  }
  func.func @transform_2(%arg0: i32, %arg1: i32) -> (i32, i32, i32) {
    %c0_i32 = arith.constant 0 : i32
    %c0_i32_0 = arith.constant 0 : i32
    return %arg0, %arg1, %c0_i32 : i32, i32, i32
  }
  func.func @transform_3(%arg0: i32, %arg1: i32) -> (i32, i32, i32) {
    %c0_i32 = arith.constant 0 : i32
    %c0_i32_0 = arith.constant 0 : i32
    return %arg0, %arg1, %c0_i32 : i32, i32, i32
  }
  func.func @transform_4(%arg0: i32, %arg1: i32) -> (i32, i32, i32) {
    %c0_i32 = arith.constant 0 : i32
    %c0_i32_0 = arith.constant 0 : i32
    return %arg0, %arg1, %c0_i32 : i32, i32, i32
  }
  func.func @transform_5(%arg0: i32, %arg1: i32) -> (i32, i32, i32) {
    %c0_i32 = arith.constant 0 : i32
    %c0_i32_0 = arith.constant 0 : i32
    return %arg0, %arg1, %c0_i32 : i32, i32, i32
  }
  func.func @transform_6(%arg0: i32, %arg1: i32) -> (i32, i32, i32) {
    %c0_i32 = arith.constant 0 : i32
    %c0_i32_0 = arith.constant 0 : i32
    %c0_i32_1 = arith.constant 0 : i32
    %c0_i32_2 = arith.constant 0 : i32
    return %c0_i32, %c0_i32_0, %c0_i32_1 : i32, i32, i32
  }
}

</mosaic_0001>

<bundles_post_ra>
// kernel: tpu_custom_call.1
= control target key start
LH: loop header
LB: loop body
LE: loop exit
PB: predicated region body
PF: predicated region fallthrough
CT: control target
= control target key end

     0   :  { %s1431_s0 = inlined_call_operand.hbm [shape: f32[2,3,8,128], index: 0, kind: input, shape index: {}]   ;;  %s1432_s1 = inlined_call_operand.hbm [shape: f32[2,8,128], index: 1, kind: input, shape index: {}]   ;;  %s1433_s2 = inlined_call_operand.hbm [shape: f32[2,8,128], index: 2, kind: input, shape index: {}]   ;;  %s1434_s3 = inlined_call_operand.hbm [shape: f32[2,8,128], index: 3, kind: input, shape index: {}]   ;;  %s1435_s4 = inlined_call_operand.hbm [shape: f32[2,8,128], index: 4, kind: input, shape index: {}]   ;;  %s1436_s5 = inlined_call_operand.hbm [shape: f32[2,8,128], index: 5, kind: output, shape index: {0}]   ;;  %s1437_s6 = inlined_call_operand.hbm [shape: f32[7,8,128], index: 6, kind: output, shape index: {1}]  }
   0x1   :  { %1447 = sst [smem:[#allocation25_spill]] %s1432_s1 }
   0x2   :  { %1448 = sst [smem:[#allocation26_spill]] %s1434_s3 }
   0x3   :  { %1449 = sst [smem:[#allocation27_spill]] %s1436_s5 }
   0x4   :  { %1450 = sst [smem:[#allocation28_spill]] %s1437_s6 }
   0x5   :  { %12 = vsyncpa [#allocation3], 0 }
   0x6   :  { %14 = vsyncpa [#allocation3 + $0x1], 0 }
   0x7   :  { %15 = vsyncpa [#allocation6], 0 }
   0x8   :  { %17 = vsyncpa [#allocation6 + $0x1], 0 }
   0x9   :  { %18 = vsyncpa [#allocation9], 0 }
   0xa   :  { %20 = vsyncpa [#allocation9 + $0x1], 0 }
   0xb   :  { %21 = vsyncpa [#allocation4], 0 }
   0xc   :  { %23 = vsyncpa [#allocation4 + $0x1], 0 }
   0xd   :  { %24 = vsyncpa [#allocation13], 0  ;;  %s1163_s21 = smov 0   ;;  %s1165_s22 = smov 0  }
   0xe   :  { %s1167_s23 = smov 0   ;;  %s1169_s24 = smov 0  }
   0xf   :  { %s1171_s25 = smov 0   ;;  %s1173_s26 = smov 0  }
  0x10 LB: > { %1451 = sst [smem:[#allocation19_spill]] %s1094_s21  ;;  %s1194_s27 = sadd.s32 4294967295, %s1114_s26   ;;  %s1114_s26 = sphi %s1173_s26, %s30_s26   ;;  %s1110_s25 = sphi %s1171_s25, %s1483_s25   ;;  %s1106_s24 = sphi %s1169_s24, %s1482_s24   ;;  %s1102_s23 = sphi %s1167_s23, %s1478_s23   ;;  %s1098_s22 = sphi %s1165_s22, %s1481_s22   ;;  %s1094_s21 = sphi %s1163_s21, %s1480_s21  }
  0x11   : > { %1452 = sst [smem:[#allocation20_spill]] %s1102_s23  ;;  %s729_s28 = sadd.s32 4294967294, %s1114_s26  }
  0x12   : > { %1453 = sst [smem:[#allocation21_spill]] %s1114_s26  ;;  %s42_s29 = sadd.s32 1, %s1110_s25 }
  0x13   : > { %s51_s30 = sadd.s32 1, %s1102_s23  ;;  %p44_p0 = scmp.ge.s32.totalorder %s42_s29, 2 }
  0x14   : > { %p58_p1 = scmp.ne.s32.totalorder %s1102_s23, %s1098_s22  ;;  %p59_p2 = scmp.eq.s32.totalorder %s1114_s26, 0 }
  0x15   : > { %p64_p3 = scmp.ne.s32.totalorder %s1098_s22, %s1094_s21  ;;  %s1485_s29 = smov (%p44_p0, %s42_s29), 0 }
  0x16   : > { %1454 = sst [smem:[#allocation22_spill]] %s1485_s29  ;;  %p1206_p4 = por %p59_p2, %p58_p1 }
  0x17   : > { %p65_p5 = scmp.eq.s32.totalorder %s1194_s27, 0  ;;  %s46_s8 = ssub.s32 %s1110_s25, %s1485_s29 }
  0x18   : > { %p1439_p6 = scmp.eq.s32.totalorder %s1194_s27, 1  ;;  %p49_p7 = scmp.eq.s32.totalorder %s46_s8, 0 }
  0x19   : > { %p1214_p8 = por %p65_p5, %p64_p3  ;;  %p208_p10 = scmp.eq.s32.totalorder %s729_s28, 1 }
  0x1a   : > { %p1220_p9 = por %p1439_p6, %p58_p1  ;;  %p796_p13 = scmp.lt.s32.totalorder %s1114_s26, 2 }
  0x1b   : > { %s1225_s11 = scalar_select %p49_p7, %s1102_s23, %s51_s30  }
  0x1c   : > { %p1227_p11 = por %p208_p10, %p64_p3  ;;  %s1234_s13 = sand.u32 1, %s1102_s23  }
  0x1d   : > { %1458 = sst [smem:[#allocation23_spill]] %s1225_s11  ;;  %s1440_s14 = sand.u32 1, %s1114_s26  }
  0x1e   : > { %s1459_s12 = scalar_select %p1227_p11, 1, 0 }
  0x1f   : > { %s1238_s15 = sshll.u32 %s1234_s13, 3  ;;  %p1242_p0 = pnand %p796_p13, %p1206_p4 }
  0x20   : > { %1460 = sst [smem:[#allocation24_spill]] %s1459_s12  ;;  %s1247_s17 = sshll.u32 %s1110_s25, 7 }
  0x21   : > { %s1462_s1 = sld [smem:[#allocation25_spill]]  ;;  %s275_s28 = scalar_lea.vmem [#allocation5], %s1238_s15 }
  0x22   : > { %s283_s30 = sshll.u32 %s275_s28, 4  ;;  %p741_p1 = scmp.ge.s32.totalorder %s1114_s26, 1  ;;  %s284_s30 = int_to_ptr.vmem [resolvable:$true] %s283_s30 }
  0x23   : > { %p345_p2 = scmp.lt.s32.totalorder %s1114_s26, 3  ;;  %s1258_s7 = scalar_lea.sflag [#allocation6], %s1440_s14 }
  0x24   : > { %p1262_p3 = pneg %p1242_p0  ;;  %s871_s29 = scalar_lea.vmem %s284_s30, 128 }
  0x25   : > { %p872_p4 = scmp.ne.s32.totalorder %s284_s30, %s871_s29  ;;  %s1116_s18 = smov [#allocation5]  }
  0x26   : > { %s876_s19 = sshll.u32 %s1116_s18, 4  ;;  %s877_s19 = int_to_ptr.vmem [resolvable:$false] %s876_s19 }
  0x27   : > { %s281_s20 = scalar_lea.hbm %s1462_s1, %s1247_s17  ;;  %p874_p5 = pnand %p872_p4, %p1262_p3 }
  0x28   : > { %s878_s28 = scalar_lea.vmem %s877_s19, 256  ;;  %p879_p10 = scmp.lt.s32.totalorder %s284_s30, %s877_s19 }
  0x29   : > { %p875_p7 = pneg %p874_p5  ;;  %p880_p13 = scmp.lt.s32.totalorder %s878_s28, %s871_s29 }
  0x2b   : > { %p881_p12 = por %p880_p13, %p879_p10 }
  0x2d   : > { %p882_p6 = pnand %p881_p12, %p875_p7 }
  0x2f   : > { %885 = shalt.err (!%p882_p6)
}
  0x30   : > { %782 = dma.hbm_to_vmem [thread:$0]  (!%p1242_p0), %s281_s20, 128, %s284_s30, %s1258_s7  }
  0x31   : > { %p1275_p4 = pnand %p741_p1, %p345_p2  ;;  %s1465_s3 = sld [smem:[#allocation26_spill]] }
  0x32   : > { %s313_s14 = scalar_lea.vmem [#allocation8], %s1238_s15  ;;  %s1466_s11 = sand.u32 1, %s1114_s26  }
  0x33   : > { %s321_s1 = sshll.u32 %s313_s14, 4  ;;  %s1286_s23 = scalar_lea.sflag [#allocation9], %s1466_s11  ;;  %s322_s1 = int_to_ptr.vmem [resolvable:$true] %s321_s1 }
  0x34   : > { %s899_s12 = scalar_lea.vmem %s322_s1, 128  ;;  %s1117_s20 = smov [#allocation8]  }
  0x35   : > { %p900_p6 = scmp.ne.s32.totalorder %s322_s1, %s899_s12  ;;  %s904_s30 = sshll.u32 %s1117_s20, 4  ;;  %s905_s30 = int_to_ptr.vmem [resolvable:$false] %s904_s30 }
  0x36   : > { %s906_s21 = scalar_lea.vmem %s905_s30, 256  ;;  %p907_p1 = scmp.lt.s32.totalorder %s322_s1, %s905_s30 }
  0x37   : > { %s319_s28 = scalar_lea.hbm %s1465_s3, %s1247_s17  ;;  %p902_p12 = pnand %p900_p6, %p1262_p3 }
  0x38   : > { %p908_p2 = scmp.lt.s32.totalorder %s906_s21, %s899_s12 }
  0x39   : > { %p903_p5 = pneg %p902_p12 }
  0x3a   : > { %p909_p7 = por %p908_p2, %p907_p1 }
  0x3c   : > { %p910_p10 = pnand %p909_p7, %p903_p5 }
  0x3e   : > { %913 = shalt.err (!%p910_p10)
}
  0x3f   : > { %788 = dma.hbm_to_vmem [thread:$0]  (!%p1242_p0), %s319_s28, 128, %s322_s1, %s1286_s23  }
  0x40   : > { %s757_s11 = smul.u32 24, %s1234_s13  ;;  %s250_s21 = scalar_lea.sflag [#allocation3], %s1234_s13 }
  0x41   : > { %s758_s14 = smul.u32 384, %s1110_s25  ;;  %s1118_s26 = smov [#allocation2]  }
  0x42   : > { %s253_s3 = scalar_lea.vmem [#allocation2], %s757_s11  ;;  %s932_s6 = sshll.u32 %s1118_s26, 4  ;;  %s933_s6 = int_to_ptr.vmem [resolvable:$false] %s932_s6 }
  0x43   : > { %s260_s20 = scalar_lea.hbm %s1431_s0, %s758_s14  ;;  %s261_s30 = sshll.u32 %s253_s3, 4  ;;  %s262_s30 = int_to_ptr.vmem [resolvable:$true] %s261_s30 }
  0x44   : > { %s927_s12 = scalar_lea.vmem %s262_s30, 384  ;;  %s934_s5 = scalar_lea.vmem %s933_s6, 768 }
  0x45   : > { %p928_p13 = scmp.ne.s32.totalorder %s262_s30, %s927_s12  ;;  %p935_p5 = scmp.lt.s32.totalorder %s262_s30, %s933_s6 }
  0x46   : > { %p936_p1 = scmp.lt.s32.totalorder %s934_s5, %s927_s12 }
  0x47   : > { %p930_p6 = pnand %p928_p13, %p1262_p3 }
  0x48   : > { %p937_p2 = por %p936_p1, %p935_p5 }
  0x49   : > { %p931_p12 = pneg %p930_p6 }
  0x4b   : > { %p938_p7 = pnand %p937_p2, %p931_p12 }
  0x4d   : > { %941 = shalt.err (!%p938_p7)
}
  0x4e   : > { %s1119_s1 = smov 128   ;;  %s1120_s3 = smov 8  }
  0x4f   : > { %779 = dma.hbm_to_vmem [thread:$0]  (!%p1242_p0), %s260_s20, 384, %s262_s30, %s250_s21, %s1119_s1, %s1119_s1, %s1120_s3  }
  0x50   : > { %s300_s11 = scalar_lea.hbm %s1433_s2, %s1247_s17  ;;  %s294_s26 = scalar_lea.vmem [#allocation7], %s1238_s15 }
  0x51   : > { %s302_s14 = sshll.u32 %s294_s26, 4  ;;  %s1121_s5 = smov [#allocation7]   ;;  %s303_s14 = int_to_ptr.vmem [resolvable:$true] %s302_s14 }
  0x52   : > { %s955_s6 = scalar_lea.vmem %s303_s14, 128  ;;  %s960_s29 = sshll.u32 %s1121_s5, 4  ;;  %s961_s29 = int_to_ptr.vmem [resolvable:$false] %s960_s29 }
  0x53   : > { %p956_p10 = scmp.ne.s32.totalorder %s303_s14, %s955_s6  ;;  %s962_s19 = scalar_lea.vmem %s961_s29, 256 }
  0x54   : > { %p963_p12 = scmp.lt.s32.totalorder %s303_s14, %s961_s29  ;;  %p964_p5 = scmp.lt.s32.totalorder %s962_s19, %s955_s6 }
  0x55   : > { %p958_p13 = pnand %p956_p10, %p1262_p3 }
  0x56   : > { %p965_p1 = por %p964_p5, %p963_p12 }
  0x57   : > { %p959_p6 = pneg %p958_p13 }
  0x59   : > { %p966_p2 = pnand %p965_p1, %p959_p6 }
  0x5b   : > { %969 = shalt.err (!%p966_p2)
}
  0x5c   : > { %785 = dma.hbm_to_vmem [thread:$0]  (!%p1242_p0), %s300_s11, 128, %s303_s14, %s1258_s7  }
  0x5d   : > { %s338_s21 = scalar_lea.hbm %s1435_s4, %s1247_s17  ;;  %s332_s12 = scalar_lea.vmem [#allocation10], %s1238_s15 }
  0x5e   : > { %s340_s1 = sshll.u32 %s332_s12, 4  ;;  %s1122_s13 = smov [#allocation10]   ;;  %s341_s1 = int_to_ptr.vmem [resolvable:$true] %s340_s1 }
  0x5f   : > { %s983_s3 = scalar_lea.vmem %s341_s1, 128  ;;  %s988_s28 = sshll.u32 %s1122_s13, 4  ;;  %s989_s28 = int_to_ptr.vmem [resolvable:$false] %s988_s28 }
  0x60   : > { %p984_p7 = scmp.ne.s32.totalorder %s341_s1, %s983_s3  ;;  %s990_s26 = scalar_lea.vmem %s989_s28, 256 }
  0x61   : > { %p991_p6 = scmp.lt.s32.totalorder %s341_s1, %s989_s28  ;;  %p992_p12 = scmp.lt.s32.totalorder %s990_s26, %s983_s3 }
  0x62   : > { %p986_p10 = pnand %p984_p7, %p1262_p3 }
  0x63   : > { %p993_p5 = por %p992_p12, %p991_p6 }
  0x64   : > { %p987_p13 = pneg %p986_p10 }
  0x66   : > { %p994_p1 = pnand %p993_p5, %p987_p13 }
  0x68   : > { %997 = shalt.err (!%p994_p1)
}
  0x69   : > { %791 = dma.hbm_to_vmem [thread:$0]  (!%p1242_p0), %s338_s21, 128, %s341_s1, %s1286_s23  }
  0x6a   : > { %349 = sbr.rel (%p1275_p4) target bundleno = 188 (0xbc), region = 40  ;;  %s1326_s15 = sand.u32 (!%p1275_p4), 1, %s1098_s22  }
  0x6b   : > { %s759_s17 = smul.u32 (!%p1275_p4), 24, %s1326_s15  ;;  %s352_s7 = scalar_lea.sflag (!%p1275_p4), [#allocation3], %s1326_s15 }
  0x6d   : > { %s1330_s8 = scalar_lea.vmem (!%p1275_p4), [#allocation2], %s759_s17 }
  0x6f   : > { %1073 = dma.done.wait (%p1214_p8), %s352_s7, 384  }
  0x70   : > { %1075 = vsyncadd (%p1214_p8), %s352_s7, 4294966912  ;;  %s360_s23 = sand.u32 1, %s1194_s27   ;;  %s1338_s16 = sshll.u32 %s1326_s15, 3 }
  0x71   : > { %s361_s18 = scalar_lea.sflag [#allocation6], %s360_s23  ;;  %s364_s11 = scalar_lea.vmem [#allocation5], %s1338_s16 }
  0x72   : > { %1077 = dma.done.wait (%p1214_p8), %s361_s18, 256  }
  0x73   : > { %1079 = vsyncadd (%p1214_p8), %s361_s18, 4294967040  ;;  %s373_s14 = scalar_lea.vmem [#allocation7], %s1338_s16  ;;  %s379_s6 = scalar_lea.sflag [#allocation9], %s360_s23 }
  0x74   : > { %s382_s5 = scalar_lea.vmem [#allocation8], %s1338_s16 }
  0x75   : > { %1081 = dma.done.wait (%p1214_p8), %s379_s6, 256  }
  0x76   : > { %1083 = vsyncadd (%p1214_p8), %s379_s6, 4294967040  ;;  %p440_p0 = scmp.eq.s32.totalorder %s1106_s24, 0  ;;  %s391_s29 = scalar_lea.vmem [#allocation10], %s1338_s16 }
  0x77   : > { %s437_s19 = scalar_lea.vmem [#allocation11], %s1338_s16  ;;  %v1123_v0 = vmov (%p440_p0), 0.0  }
  0x78   : > { %445 = sbr.rel (!%p440_p0) target bundleno = 125 (0x7d), region = 64  ;;  %446 = vst [vmem:[#allocation12] sm:$0xff] (%p440_p0), %v1123_v0  ;;  %447 = vst [vmem:[#allocation12 + $0x8] sm:$0xff] (%p440_p0), %v1123_v0 }
  0x79   : > { %448 = vst [vmem:[#allocation12 + $0x10] sm:$0xff] (%p440_p0), %v1123_v0  ;;  %449 = vst [vmem:[#allocation12 + $0x18] sm:$0xff] (%p440_p0), %v1123_v0 }
  0x7a   : > { %450 = vst [vmem:[#allocation12 + $0x20] sm:$0xff] (%p440_p0), %v1123_v0  ;;  %451 = vst [vmem:[#allocation12 + $0x28] sm:$0xff] (%p440_p0), %v1123_v0 }
  0x7b   : > { %452 = vst [vmem:[#allocation12 + $0x30] sm:$0xff] (%p440_p0), %v1123_v0 }
  0x7d PF: > { %v453_v1 = vld [vmem:[%s1330_s8] sm:$0xff]  ;;  %v748_v9 = vld [vmem:[%s1330_s8 + $0x8] sm:$0xff]  ;;  %v749_v15 = vld [vmem:[%s1330_s8 + $0x10] sm:$0xff]  ;;  %s751_s9 = sshll.u32 %s1106_s24, 7  ;;  %s533_s20 = sshll.u32 %s437_s19, 4  ;;  %s1365_s20 = int_to_ptr.vmem [resolvable:$true] %s533_s20 }
  0x7e   : > { %v458_v2 = vld [vmem:[%s364_s11] sm:$0xff]  ;;  %v459_v3 = vld [vmem:[%s373_s14] sm:$0xff]  ;;  %854 = vlog2.f32 %v453_v1  ;;  %v467_v5 = vsub.f32 1.0, %v453_v1  ;;  %s1124_s30 = smov [#allocation12]   ;;  %s1467_s3 = sld [smem:[#allocation27_spill]] }
  0x7f   : > { %v462_v4 = vmul.f32 %v459_v3, %v458_v2  ;;  %v489_v6 = vld [vmem:[#allocation12 + $0x8] sm:$0xff]  ;;  %v460_v10 = vld [vmem:[%s382_s5] sm:$0xff]  ;;  %v483_v19 = vmul.f32 %v749_v15, %v459_v3  ;;  %v472_v32 = vsub.f32 1.0, %v458_v2  ;;  %v484_v39 = vld [vmem:[#allocation12] sm:$0xff]  ;;  %s543_s21 = sshll.u32 %s1124_s30, 4  ;;  %s519_s24 = scalar_lea.sflag [#allocation4], %s1326_s15  ;;  %s1369_s21 = int_to_ptr.vmem [resolvable:$true] %s543_s21 }
  0x80   : > { %v494_v7 = vld [vmem:[#allocation12 + $0x10] sm:$0xff]  ;;  %856 = vlog2.f32 %v467_v5  ;;  %v461_v12 = vld [vmem:[%s391_s29] sm:$0xff]  ;;  %v479_v13 = vsub.f32 %v748_v9, %v460_v10  ;;  %v499_v22 = vld [vmem:[#allocation12 + $0x18] sm:$0xff]  ;;  %s998_s28 = scalar_lea.vmem %s1365_s20, 128  ;;  %s1125_s26 = smov [#allocation11]  }
  0x81   : > { %v496_v8 = vadd.f32 %v494_v7, %v459_v3  ;;  %v491_v11 = vadd.f32 %v489_v6, %v462_v4  ;;  %v504_v14 = vld [vmem:[#allocation12 + $0x20] sm:$0xff]  ;;  %v482_v17 = vmul.f32 %v749_v15, %v462_v4  ;;  %v509_v18 = vld [vmem:[#allocation12 + $0x28] sm:$0xff]  ;;  %v463_v36 = vsub.f32 %v459_v3, %v462_v4  ;;  %p999_p8 = scmp.ne.s32.totalorder %s1365_s20, %s998_s28  ;;  %s1002_s17 = sshll.u32 %s1125_s26, 4  ;;  %s1003_s17 = int_to_ptr.vmem [resolvable:$false] %s1002_s17 }
  0x82   : > { %v506_v16 = vadd.f32 %v504_v14, %v461_v12  ;;  %v514_v20 = vld [vmem:[#allocation12 + $0x30] sm:$0xff]  ;;  %v480_v21 = vand.u32 2147483647, %v479_v13  ;;  %s1004_s7 = scalar_lea.vmem %s1003_s17, 256  ;;  %p1005_p2 = scmp.lt.s32.totalorder %s1365_s20, %s1003_s17 }
  0x83   : > { %497 = vst [vmem:[#allocation12 + $0x10] sm:$0xff] %v496_v8  ;;  %492 = vst [vmem:[#allocation12 + $0x8] sm:$0xff] %v491_v11  ;;  %v511_v23 = vadd.f32 %v509_v18, %v482_v17  ;;  %v516_v24 = vadd.f32 %v514_v20, %v483_v19  ;;  %p1000_p3 = pnand %p999_p8, %p1220_p9  ;;  %p1006_p7 = scmp.lt.s32.totalorder %s1004_s7, %s998_s28 }
  0x84   : > { %507 = vst [vmem:[#allocation12 + $0x20] sm:$0xff] %v506_v16  ;;  %v481_v25 = vmul.f32 %v480_v21, %v461_v12  ;;  %s1363_s13 = scalar_lea.hbm %s1467_s3, %s751_s9 }
  0x85   : > { %512 = vst [vmem:[#allocation12 + $0x28] sm:$0xff] %v511_v23  ;;  %517 = vst [vmem:[#allocation12 + $0x30] sm:$0xff] %v516_v24  ;;  %p1001_p4 = pneg %p1000_p3  ;;  %p1007_p10 = por %p1006_p7, %p1005_p2 }
  0x86   : > { %v501_v26 = vadd.f32 %v499_v22, %v481_v25 }
  0x87   : > { %p1008_p13 = pnand %p1007_p10, %p1001_p4 }
  0x88   : > { %502 = vst [vmem:[#allocation12 + $0x18] sm:$0xff] %v501_v26 }
  0x8b   : > { %v855_v27 = vpop.eup %854 }
  0x8c   : > { %v465_v28 = vmul.f32 0.6931472, %v855_v27 }
  0x8d   : > { %v857_v29 = vpop.eup %856 }
  0x8e   : > { %v466_v30 = vmax.f32 %v465_v28, -100.0  ;;  %v469_v31 = vmul.f32 0.6931472, %v857_v29 }
  0x90   : > { %v470_v33 = vmax.f32 %v469_v31, -100.0  ;;  %v471_v34 = vmul.f32 %v466_v30, %v458_v2 }
  0x92   : > { %v473_v35 = vmul.f32 %v472_v32, %v470_v33 }
  0x94   : > { %v474_v37 = vadd.f32 %v473_v35, %v471_v34 }
  0x96   : > { %v475_v38 = vsub.f32 0.0, %v474_v37 }
  0x98   : > { %v477_v40 = vmul.f32 %v475_v38, %v463_v36  ;;  %v476_v41 = vmul.f32 %v475_v38, %v462_v4 }
  0x9a   : > { %478 = vst [vmem:[%s437_s19] sm:$0xff] %v477_v40  ;;  %v486_v42 = vadd.f32 %v484_v39, %v476_v41 }
  0x9b   : > { %1011 = shalt.err (!%p1008_p13)
}
  0x9c   : > { %s1012_s8 = scalar_lea.hbm %s1363_s13, 128  ;;  %s1016_s16 = scalar_lea.hbm %s1467_s3, 256 }
  0x9d   : > { %p1013_p6 = scmp.ne.s32.totalorder %s1363_s13, %s1012_s8  ;;  %p1017_p1 = scmp.lt.s32.totalorder %s1363_s13, %s1467_s3 }
  0x9e   : > { %p1018_p0 = scmp.lt.s32.totalorder %s1016_s16, %s1012_s8 }
  0x9f   : > { %p1014_p12 = pnand %p1013_p6, %p1220_p9 }
  0xa0   : > { %p1019_p8 = por %p1018_p0, %p1017_p1 }
  0xa1   : > { %p1015_p5 = pneg %p1014_p12 }
  0xa3   : > { %p1020_p3 = pnand %p1019_p8, %p1015_p5 }
  0xa5   : > { %1023 = shalt.err (!%p1020_p3)
}
  0xa6   : > { %770 = dma.vmem_to_hbm [thread:$0]  (%p1220_p9), %s1365_s20, 128, %s1363_s13, %s519_s24   ;;  %487 = vst [vmem:[#allocation12] sm:$0xff] %v486_v42 }
  0xa7   : > { %s1024_s14 = scalar_lea.vmem %s1369_s21, 896  ;;  %p1468_p2 = scmp.eq.s32.totalorder %s1194_s27, 1 }
  0xa8   : > { %p1025_p4 = scmp.ne.s32.totalorder %s1369_s21, %s1024_s14  ;;  %p1031_p13 = scmp.lt.s32.totalorder %s1369_s21, %s1369_s21 }
  0xa9   : > { %p1032_p6 = scmp.lt.s32.totalorder %s1024_s14, %s1024_s14 }
  0xaa   : > { %p1026_p7 = pnand %p1025_p4, %p1468_p2 }
  0xab   : > { %p1033_p12 = por %p1032_p6, %p1031_p13 }
  0xac   : > { %p1027_p10 = pneg %p1026_p7 }
  0xae   : > { %p1034_p5 = pnand %p1033_p12, %p1027_p10 }
  0xb0   : > { %1037 = shalt.err (!%p1034_p5)
}
  0xb1   : > { %s1126_s10 = smov 128   ;;  %s1127_s6 = smov 8  }
  0xb2   : > { %p1469_p1 = pmov %p1468_p2  ;;  %s1470_s19 = sld [smem:[#allocation28_spill]] }
  0xb4   : > { %p1471_p9 = pmov %p1469_p1 }
  0xb8   : > { %772 = dma.vmem_to_hbm [thread:$0]  (%p1469_p1), %s1369_s21, 896, %s1470_s19, [#allocation13], %s1126_s10, %s1126_s10, %s1127_s6  }
  0xb9   : > { %1085 = dma.done.wait (%p1471_p9), [#allocation13], 896   ;;  %p1472_p0 = pmov %p1469_p1 }
  0xbb   : > { %1087 = vsyncadd (%p1472_p0), [#allocation13], 4294966400 }
  0xbc PF: > { %s1473_s9 = sld [smem:[#allocation19_spill]] }
  0xbd   : > { %s1475_s30 = sld [smem:[#allocation21_spill]] }
  0xc2   : > { %s562_s12 = sand.u32 1, %s1473_s9  }
  0xc3   : > { %p1476_p8 = scmp.ge.s32.totalorder %s1475_s30, 2  ;;  %s563_s1 = scalar_lea.sflag [#allocation4], %s562_s12 }
  0xc5   : > { %p793_p3 = pnand %p1476_p8, %p1227_p11 }
  0xc7   : > { %p794_p4 = pneg %p793_p3 }
  0xc9   : > { %1089 = dma.done.wait (%p794_p4), %s563_s1, 128  }
  0xca   : > { %1091 = vsyncadd (%p794_p4), %s563_s1, 4294967168  ;;  %s30_s26 = sadd.s32 1, %s1475_s30   ;;  %s1477_s13 = sld [smem:[#allocation20_spill]] }
  0xcb   : > { %p27_p2 = scmp.ge.s32.totalorder %s30_s26, 4   ;;  %s1478_s23 = sld [smem:[#allocation23_spill]] }
  0xcc   : > { %s1479_s27 = sld [smem:[#allocation22_spill]]  ;;  %s1480_s21 = smov %s1098_s22 }
  0xcd   : > { %s1482_s24 = smov %s1110_s25 }
  0xce   :  { %29 = sbr.rel (!%p27_p2) target bundleno = 16 (0x10), region = 153 }
  0xd0   : > { %s1481_s22 = smov %s1477_s13 }
  0xd2   : > { %s1483_s25 = smov %s1479_s27 }
  0xd3   :  { %568 = vsyncpa [#allocation3], 1 }
  0xd4   :  { %570 = vsyncpa [#allocation3 + $0x1], 1 }
  0xd5   :  { %571 = vsyncpa [#allocation6], 1 }
  0xd6   :  { %573 = vsyncpa [#allocation6 + $0x1], 1 }
  0xd7   :  { %574 = vsyncpa [#allocation9], 1 }
  0xd8   :  { %576 = vsyncpa [#allocation9 + $0x1], 1 }
  0xd9   :  { %577 = vsyncpa [#allocation4], 1 }
  0xda   :  { %579 = vsyncpa [#allocation4 + $0x1], 1 }
  0xdb   :  { %580 = vsyncpa [#allocation13], 1 }

</bundles_post_ra>
